<compile_context>
chip_gen: v6e
topology: v6e:2x2x1
jax: 0.10.0
libtpu: 0.0.40
codegen_flags: <defaults>
</compile_context>

<pallas_src>
import functools

import jax
import jax.numpy as jnp
from jax import lax
from jax.experimental import pallas as pl
from jax.experimental.pallas import tpu as pltpu

_LANE = 128


def _round_up(x, m):
    return (x + m - 1) // m * m


def _vmem_capacity_bytes():
    try:
        return int(pltpu.get_tpu_info().vmem_capacity_bytes)
    except Exception:
        return 64 * 1024 * 1024  # conservative fallback (v7x per-TC VMEM)


def _channel_attention_kernel(x_ref, w12_ref, b12_ref, w2_ref, b2_ref, o_ref,
                              *, compute_dtype):
    """Two fused matmuls + ReLU + residual on one (bm, L) row tile."""
    x = x_ref[...]                       # single load; reused for the residual
    xf = x.astype(jnp.float32)

    # fused (conv1x1 @ in_feature): bf16 operands, f32 accumulation on the MXU
    h = jnp.dot(x.astype(compute_dtype), w12_ref[...],
                preferred_element_type=jnp.float32)
    # bias + ReLU in f32, then narrow eagerly (cast needed for the next dot anyway)
    h = jnp.maximum(h + b12_ref[...], 0.0).astype(compute_dtype)
    # channel_linear.out_feature
    y = jnp.dot(h, w2_ref[...], preferred_element_type=jnp.float32) + b2_ref[...]
    # residual add in f32
    o_ref[...] = (y + xf).astype(o_ref.dtype)


def channel_attention_forward(x, params, *, compute_dtype=jnp.bfloat16,
                              out_dtype=None):
    """x: (frame_counts, 16, C).  params: weights stored (in, out) — see init_params."""
    fc, s, C = x.shape
    N = fc * s
    out_dtype = x.dtype if out_dtype is None else out_dtype
    f32 = jnp.float32

    # ---- trace-time fusion of conv1x1 with channel_linear.in_feature -------
    wc, w1, w2 = (params["wc"].astype(f32), params["w1"].astype(f32),
                  params["w2"].astype(f32))
    bc, b1, b2 = (params["bc"].astype(f32), params["b1"].astype(f32),
                  params["b2"].astype(f32))
    w12 = wc @ w1                  # exact: no activation between conv1 and in_feature
    b12 = bc @ w1 + b1

    # ---- feature-axis layout: lane-dense without zero padding when possible
    if C % _LANE == 0:
        k, L = 1, C                                   # already lane-dense
    elif _LANE % C == 0 and N % (_LANE // C) == 0:
        k, L = _LANE // C, _LANE                      # pack k rows per 128 lanes
    else:
        k, L = 1, _round_up(C, _LANE)                 # zero-pad fallback (rare)

    def prep_w(w):                                    # (C,C) f32 -> (L,L) bf16
        if k > 1:
            w = jnp.kron(jnp.eye(k, dtype=f32), w)    # k copies, block-diagonal
        elif L != C:
            w = jnp.pad(w, ((0, L - C), (0, L - C)))
        return w.astype(compute_dtype)

    def prep_b(b):                                    # (1,C) f32 -> (1,L) f32
        if k > 1:
            return jnp.tile(b, (1, k))
        if L != C:
            return jnp.pad(b, ((0, 0), (0, L - C)))
        return b

    w12p, w2p = prep_w(w12), prep_w(w2)
    b12p, b2p = prep_b(b12), prep_b(b2)

    x2 = x.reshape(N, C)
    if k > 1:
        x2 = x2.reshape(N // k, k * C)                # contiguous reshape, no copy
    elif L != C:
        x2 = jnp.pad(x2, ((0, 0), (0, L - C)))        # fallback path only
    n_rows = x2.shape[0]

    # ---- row tiling: aim for >= ~8 grid steps, generation-aware tile cap ---
    vmem_cap = _vmem_capacity_bytes()
    block_rows_max = 1024 if vmem_cap >= 96 * 1024 * 1024 else 512
    bm = _round_up(max(pl.cdiv(n_rows, 8), 8), 8)
    if bm >= 128:
        bm = _round_up(bm, 128)        # native MXU granularity for big tiles
    bm = min(bm, block_rows_max)
    grid = (pl.cdiv(n_rows, bm),)      # ragged last tile is masked by Pallas

    # ---- explicit VMEM budget (double-buffered tiles + resident weights) ---
    xb = jnp.dtype(x.dtype).itemsize
    ob = jnp.dtype(out_dtype).itemsize
    wb = jnp.dtype(compute_dtype).itemsize
    est = (2 * bm * L * xb           # input tiles (double-buffered)
           + 2 * bm * L * ob         # output tiles (double-buffered)
           + 2 * 2 * L * L * wb      # two resident weights (alloc'd double-buffered)
           + 2 * 2 * 8 * L * 4       # biases (sublane padded, double-buffered)
           + 2 * bm * L * 4)         # live f32 intermediates / spill slack
    limit_cap = max(int(0.6 * vmem_cap), 32 * 1024 * 1024)
    vmem_limit = int(min(max(2 * est, 32 * 1024 * 1024), limit_cap))

    const = lambda shape: pl.BlockSpec(shape, lambda i: (0, 0))

    out = pl.pallas_call(
        functools.partial(_channel_attention_kernel, compute_dtype=compute_dtype),
        out_shape=jax.ShapeDtypeStruct((n_rows, L), out_dtype),
        grid_spec=pltpu.PrefetchScalarGridSpec(
            num_scalar_prefetch=0,
            grid=grid,
            in_specs=[
                pl.BlockSpec((bm, L), lambda i: (i, 0)),   # x row tile
                const((L, L)), const((1, L)),              # fused W12, b12
                const((L, L)), const((1, L)),              # out_feature W2, b2
            ],
            out_specs=pl.BlockSpec((bm, L), lambda i: (i, 0)),
        ),
        compiler_params=pltpu.CompilerParams(
            dimension_semantics=("parallel",),
            vmem_limit_bytes=vmem_limit,
        ),
    )(x2, w12p, b12p, w2p, b2p)

    if k == 1 and L != C:
        out = out[:, :C]               # only on the zero-pad fallback path
    return out.reshape(fc, s, C)


def init_params(key, channel_dim, dtype=jnp.float32):
    """Mimics torch defaults (uniform +-1/sqrt(fan_in)); weights stored (in, out).
    A loader importing real PyTorch Conv1d (out,in,1) / Linear (out,in) weights
    must transpose them into this layout."""
    C = channel_dim
    ks = jax.random.split(key, 6)

    def lin(kw, kb, fan_in, fan_out):
        bound = 1.0 / (fan_in ** 0.5)
        w = jax.random.uniform(kw, (fan_in, fan_out), dtype, -bound, bound)
        b = jax.random.uniform(kb, (1, fan_out), dtype, -bound, bound)
        return w, b

    wc, bc = lin(ks[0], ks[1], C, C)   # Conv1d(C, C, 1) == pointwise linear
    w1, b1 = lin(ks[2], ks[3], C, C)   # channel_linear.in_feature
    w2, b2 = lin(ks[4], ks[5], C, C)   # channel_linear.out_feature
    return dict(wc=wc, bc=bc, w1=w1, b1=b1, w2=w2, b2=b2)


def _reference_mixed(x, p, compute_dtype=jnp.bfloat16):
    """Pure-JAX mirror of the kernel's fused bf16-matmul / f32-accumulate math."""
    fc, s, C = x.shape
    f32 = jnp.float32
    xr = x.reshape(-1, C).astype(f32)
    w12 = p["wc"].astype(f32) @ p["w1"].astype(f32)
    b12 = p["bc"].astype(f32) @ p["w1"].astype(f32) + p["b1"].astype(f32)
    cd = compute_dtype
    mm = lambda a, w: lax.dot(a.astype(cd), w.astype(cd),
                              preferred_element_type=f32)
    h = jnp.maximum(mm(xr, w12) + b12, 0.0)
    y = mm(h, p["w2"]) + p["b2"].astype(f32)
    return (y + xr).reshape(fc, s, C)


def _reference_f32(x, p):
    fc, s, C = x.shape
    xr = x.reshape(-1, C).astype(jnp.float32)
    h = xr @ p["wc"] + p["bc"]
    h = jnp.maximum(h @ p["w1"] + p["b1"], 0.0)
    y = h @ p["w2"] + p["b2"]
    return (y + xr).reshape(fc, s, C)


def _check_case(key, fc, spatial, C):
    k_x, k_p = jax.random.split(key)
    x = jax.random.normal(k_x, (fc, spatial, C), jnp.float32)
    params = init_params(k_p, C)

    out = jax.block_until_ready(channel_attention_forward(x, params))
    assert out.shape == x.shape and out.dtype == x.dtype

    ref_mixed = _reference_mixed(x, params)
    assert jnp.allclose(out, ref_mixed, atol=1e-3, rtol=1e-3), \
        f"mismatch vs bf16-mirrored reference for shape {(fc, spatial, C)}"

    ref_f32 = _reference_f32(x, params)
    assert jnp.allclose(out, ref_f32, atol=5e-2, rtol=5e-2), \
        f"mismatch vs f32 reference for shape {(fc, spatial, C)}"


if __name__ == "__main__":
    key = jax.random.PRNGKey(0)
    keys = jax.random.split(key, 3)

    # Module input layout: [frame_counts, 16, channel]
    # Main case: C=32 -> 4-row lane packing, 128 packed rows, bm=16, grid=(8,)
    _check_case(keys[0], 32, 16, 32)
    # Ragged row count with packing (masked edge tile).
    _check_case(keys[1], 5, 16, 32)
    # C that neither divides nor is divided by 128 -> zero-pad fallback path.
    _check_case(keys[2], 7, 16, 48)

    print("KERNEL_OK")
</pallas_src>

<mosaic_0001>
module attributes {stable_mosaic.version = 11 : i64} {
  func.func @_channel_attention_kernel(%arg0: i32, %arg1: memref<16x128xf32, #tpu.memory_space<vmem>>, %arg2: memref<128x128xbf16, #tpu.memory_space<vmem>>, %arg3: memref<1x128xf32, #tpu.memory_space<vmem>>, %arg4: memref<128x128xbf16, #tpu.memory_space<vmem>>, %arg5: memref<1x128xf32, #tpu.memory_space<vmem>>, %arg6: memref<16x128xf32, #tpu.memory_space<vmem>>) attributes {dimension_semantics = [#tpu.dimension_semantics<parallel>], iteration_bounds = array<i64: 8>, scalar_prefetch = 0 : i64, scratch_operands = 0 : i64, tpu.core_type = #tpu.core_type<tc>, window_params = [{transform_indices = @transform_0, window_bounds = array<i64: 16, 128>}, {pipeline_mode = #tpu.pipeline_mode<synchronous>, transform_indices = @transform_1, window_bounds = array<i64: 128, 128>}, {pipeline_mode = #tpu.pipeline_mode<synchronous>, transform_indices = @transform_2, window_bounds = array<i64: 1, 128>}, {pipeline_mode = #tpu.pipeline_mode<synchronous>, transform_indices = @transform_3, window_bounds = array<i64: 128, 128>}, {pipeline_mode = #tpu.pipeline_mode<synchronous>, transform_indices = @transform_4, window_bounds = array<i64: 1, 128>}, {transform_indices = @transform_5, window_bounds = array<i64: 16, 128>}]} {
    %c0 = arith.constant 0 : index
    %c0_0 = arith.constant 0 : index
    %0 = vector.load %arg1[%c0, %c0_0] : memref<16x128xf32, #tpu.memory_space<vmem>>, vector<16x128xf32>
    %1 = arith.truncf %0 : vector<16x128xf32> to vector<16x128xbf16>
    %c0_1 = arith.constant 0 : index
    %c0_2 = arith.constant 0 : index
    %2 = vector.load %arg2[%c0_1, %c0_2] : memref<128x128xbf16, #tpu.memory_space<vmem>>, vector<128x128xbf16>
    %cst = arith.constant dense<0.000000e+00> : vector<16x128xf32>
    %3 = tpu.matmul %1, %2, %cst {dimension_numbers = #tpu.dot_dimension_numbers<[1], [0], [0], [1], [0, 0, 1, 1], [], []>} : vector<16x128xbf16>, vector<128x128xbf16>, vector<16x128xf32> -> vector<16x128xf32>
    %c0_3 = arith.constant 0 : index
    %c0_4 = arith.constant 0 : index
    %4 = vector.load %arg3[%c0_3, %c0_4] : memref<1x128xf32, #tpu.memory_space<vmem>>, vector<1x128xf32>
    %5 = vector.broadcast %4 : vector<1x128xf32> to vector<16x128xf32>
    %6 = arith.addf %3, %5 : vector<16x128xf32>
    %cst_5 = arith.constant 0.000000e+00 : f32
    %7 = vector.broadcast %cst_5 : f32 to vector<16x128xf32>
    %8 = arith.maximumf %6, %7 : vector<16x128xf32>
    %9 = arith.truncf %8 : vector<16x128xf32> to vector<16x128xbf16>
    %c0_6 = arith.constant 0 : index
    %c0_7 = arith.constant 0 : index
    %10 = vector.load %arg4[%c0_6, %c0_7] : memref<128x128xbf16, #tpu.memory_space<vmem>>, vector<128x128xbf16>
    %cst_8 = arith.constant dense<0.000000e+00> : vector<16x128xf32>
    %11 = tpu.matmul %9, %10, %cst_8 {dimension_numbers = #tpu.dot_dimension_numbers<[1], [0], [0], [1], [0, 0, 1, 1], [], []>} : vector<16x128xbf16>, vector<128x128xbf16>, vector<16x128xf32> -> vector<16x128xf32>
    %c0_9 = arith.constant 0 : index
    %c0_10 = arith.constant 0 : index
    %12 = vector.load %arg5[%c0_9, %c0_10] : memref<1x128xf32, #tpu.memory_space<vmem>>, vector<1x128xf32>
    %13 = vector.broadcast %12 : vector<1x128xf32> to vector<16x128xf32>
    %14 = arith.addf %11, %13 : vector<16x128xf32>
    %15 = arith.addf %14, %0 : vector<16x128xf32>
    %c0_11 = arith.constant 0 : index
    %c0_12 = arith.constant 0 : index
    %16 = vector.load %arg6[%c0_11, %c0_12] : memref<16x128xf32, #tpu.memory_space<vmem>>, vector<16x128xf32>
    tpu.vector_store %arg6[%c0_11, %c0_12], %15 {strides = array<i32>} : memref<16x128xf32, #tpu.memory_space<vmem>>, vector<16x128xf32>,
    return
  }
  func.func @transform_0(%arg0: i32) -> (i32, i32) {
    %c0_i32 = arith.constant 0 : i32
    %c0_i32_0 = arith.constant 0 : i32
    return %arg0, %c0_i32 : i32, i32
  }
  func.func @transform_1(%arg0: i32) -> (i32, i32) {
    %c0_i32 = arith.constant 0 : i32
    %c0_i32_0 = arith.constant 0 : i32
    %c0_i32_1 = arith.constant 0 : i32
    return %c0_i32, %c0_i32_0 : i32, i32
  }
  func.func @transform_2(%arg0: i32) -> (i32, i32) {
    %c0_i32 = arith.constant 0 : i32
    %c0_i32_0 = arith.constant 0 : i32
    %c0_i32_1 = arith.constant 0 : i32
    return %c0_i32, %c0_i32_0 : i32, i32
  }
  func.func @transform_3(%arg0: i32) -> (i32, i32) {
    %c0_i32 = arith.constant 0 : i32
    %c0_i32_0 = arith.constant 0 : i32
    %c0_i32_1 = arith.constant 0 : i32
    return %c0_i32, %c0_i32_0 : i32, i32
  }
  func.func @transform_4(%arg0: i32) -> (i32, i32) {
    %c0_i32 = arith.constant 0 : i32
    %c0_i32_0 = arith.constant 0 : i32
    %c0_i32_1 = arith.constant 0 : i32
    return %c0_i32, %c0_i32_0 : i32, i32
  }
  func.func @transform_5(%arg0: i32) -> (i32, i32) {
    %c0_i32 = arith.constant 0 : i32
    %c0_i32_0 = arith.constant 0 : i32
    return %arg0, %c0_i32 : i32, i32
  }
}

</mosaic_0001>

<bundles_post_ra>
// kernel: tpu_custom_call.1
= control target key start
LH: loop header
LB: loop body
LE: loop exit
PB: predicated region body
PF: predicated region fallthrough
CT: control target
= control target key end

     0   :  { %10 = vsyncpa [#allocation3], 0  ;;  %s1194_s0 = inlined_call_operand.hbm [shape: f32[128,128], index: 0, kind: input, shape index: {}]   ;;  %s1195_s1 = inlined_call_operand.hbm [shape: bf16[128,128], index: 1, kind: input, shape index: {}]   ;;  %s1196_s2 = inlined_call_operand.vmem [shape: f32[1,128], index: 2, kind: input, shape index: {}]   ;;  %s1197_s3 = inlined_call_operand.hbm [shape: bf16[128,128], index: 3, kind: input, shape index: {}]   ;;  %s1198_s4 = inlined_call_operand.vmem [shape: f32[1,128], index: 4, kind: input, shape index: {}]   ;;  %s1199_s5 = inlined_call_operand.hbm [shape: f32[128,128], index: 5, kind: output, shape index: {}]  }
   0x1   :  { %12 = vsyncpa [#allocation3 + $0x1], 0 }
   0x2   :  { %13 = vsyncpa [#allocation6], 0 }
   0x3   :  { %14 = vsyncpa [#allocation4], 0 }
   0x4   :  { %16 = vsyncpa [#allocation4 + $0x1], 0  ;;  %s994_s18 = smov 0   ;;  %s996_s19 = smov 0  }
   0x5   :  { %s998_s20 = smov 0   ;;  %s1000_s21 = smov 0  }
   0x6 LB: > { %s1015_s22 = sadd.s32 4294967295, %s950_s21   ;;  %s615_s23 = sadd.s32 4294967294, %s950_s21   ;;  %s950_s21 = sphi %s1000_s21, %s1220_s21   ;;  %s946_s20 = sphi %s998_s20, %s1219_s20   ;;  %s942_s19 = sphi %s996_s19, %s1218_s19   ;;  %s938_s18 = sphi %s994_s18, %s1217_s18  }
   0x7   : > { %p42_p0 = scmp.ne.s32.totalorder %s942_s19, %s938_s18  ;;  %p1200_p1 = scmp.eq.s32.totalorder %s1015_s22, 0 }
   0x8   : > { %p156_p3 = scmp.eq.s32.totalorder %s615_s23, 7  ;;  %p616_p5 = scmp.ge.s32.totalorder %s950_s21, 1 }
   0x9   : > { %p1024_p4 = por %p1200_p1, %p42_p0  ;;  %p163_p7 = scmp.lt.s32.totalorder %s950_s21, 9 }
   0xa   : > { %p1029_p6 = por %p156_p3, %p42_p0  ;;  %s952_s27 = smov [#allocation5]  }
   0xb   : > { %s1204_s24 = scalar_select %p1024_p4, 1, 0 }
   0xc   : > { %s1205_s25 = scalar_select %p1029_p6, 1, 0 }
   0xd   : > { %p1034_p8 = pnand %p616_p5, %p163_p7  ;;  %s175_s28 = sshll.u32 %s952_s27, 4  ;;  %s176_s28 = int_to_ptr.vmem [resolvable:$true] %s175_s28 }
   0xe   : > { %s953_s30 = smov [#allocation7]   ;;  %s813_s7 = scalar_lea.vmem %s176_s28, 1024 }
   0xf   : > { %s1206_s26 = scalar_select %p1034_p8, 1, 0 }
  0x10   : > { %p723_p9 = pneg %p1034_p8  ;;  %s191_s6 = sshll.u32 %s953_s30, 4  ;;  %s192_s6 = int_to_ptr.vmem [resolvable:$true] %s191_s6 }
  0x11   : > { %p814_p12 = scmp.ne.s32.totalorder %s176_s28, %s813_s7  ;;  %p821_p3 = scmp.lt.s32.totalorder %s176_s28, %s176_s28 }
  0x12   : > { %p1042_p10 = pnand %p723_p9, %p1200_p1  ;;  %p822_p5 = scmp.lt.s32.totalorder %s813_s7, %s813_s7 }
  0x14   : > { %p804_p11 = pneg %p1042_p10  ;;  %p823_p7 = por %p822_p5, %p821_p3 }
  0x16   : > { %p816_p13 = pnand %p814_p12, %p804_p11 }
  0x18   : > { %p817_p0 = pneg %p816_p13 }
  0x1a   : > { %p824_p9 = pnand %p823_p7, %p817_p0 }
  0x1c   : > { %827 = shalt.err (!%p824_p9)
}
  0x1d   : > { %s954_s8 = smov 64   ;;  %s955_s9 = smov 4  }
  0x1e   : > { %726 = dma.hbm_to_vmem [thread:$0]  (!%p1042_p10), %s1195_s1, 1024, %s176_s28, [#allocation6], %s954_s8, %s954_s8, %s955_s9  }
  0x1f   : > { %s839_s12 = scalar_lea.vmem %s192_s6, 1024  ;;  %p847_p2 = scmp.lt.s32.totalorder %s192_s6, %s192_s6 }
  0x20   : > { %p840_p1 = scmp.ne.s32.totalorder %s192_s6, %s839_s12  ;;  %p848_p6 = scmp.lt.s32.totalorder %s839_s12, %s839_s12 }
  0x22   : > { %p842_p12 = pnand %p840_p1, %p804_p11  ;;  %p849_p3 = por %p848_p6, %p847_p2 }
  0x24   : > { %p843_p13 = pneg %p842_p12 }
  0x26   : > { %p850_p0 = pnand %p849_p3, %p843_p13 }
  0x28   : > { %853 = shalt.err (!%p850_p0)
}
  0x29   : > { %729 = dma.hbm_to_vmem [thread:$0]  (!%p1042_p10), %s1197_s3, 1024, %s192_s6, [#allocation6], %s954_s8, %s954_s8, %s955_s9  }
  0x2a   : > { %s1065_s15 = sadd.s32 1, %s950_s21   ;;  %s29_s16 = sadd.s32 1, %s946_s20 }
  0x2b   : > { %s26_s17 = ssub.s32 %s950_s21, %s1065_s15  ;;  %p36_p1 = scmp.ne.s32.totalorder %s946_s20, %s942_s19 }
  0x2c   : > { %p27_p2 = scmp.eq.s32.totalorder %s26_s17, 0  ;;  %p37_p6 = scmp.eq.s32.totalorder %s950_s21, 0 }
  0x2d   : > { %p1208_p11 = scmp.eq.s32.totalorder %s1015_s22, 7  ;;  %p740_p7 = scmp.lt.s32.totalorder %s950_s21, 8 }
  0x2e   : > { %s1081_s27 = scalar_select %p27_p2, %s946_s20, %s29_s16  }
  0x2f   : > { %p1075_p5 = por %p1208_p11, %p36_p1  ;;  %p38_p9 = por %p37_p6, %p36_p1 }
  0x30   : > { %s208_s28 = sand.u32 1, %s946_s20   ;;  %s651_s30 = sshll.u32 %s950_s21, 8 }
  0x31   : > { %s1209_s23 = scalar_select %p1075_p5, 1, 0 }
  0x32   : > { %s620_s29 = sshll.u32 %s208_s28, 4  ;;  %s1088_s8 = scalar_lea.hbm %s1194_s0, %s651_s30 }
  0x33   : > { %s212_s9 = scalar_lea.vmem [#allocation2], %s620_s29  ;;  %p1092_p10 = pnand %p740_p7, %p38_p9 }
  0x34   : > { %s219_s10 = sshll.u32 %s212_s9, 4  ;;  %s1096_s12 = scalar_lea.sflag [#allocation3], %s208_s28  ;;  %s1090_s10 = int_to_ptr.vmem [resolvable:$true] %s219_s10 }
  0x35   : > { %s854_s13 = scalar_lea.hbm %s1088_s8, 256  ;;  %p856_p13 = pneg %p1092_p10 }
  0x36   : > { %p855_p12 = scmp.ne.s32.totalorder %s1088_s8, %s854_s13  ;;  %s859_s17 = scalar_lea.hbm %s1194_s0, 2048 }
  0x37   : > { %p860_p1 = scmp.lt.s32.totalorder %s1088_s8, %s1194_s0  ;;  %p861_p2 = scmp.lt.s32.totalorder %s859_s17, %s854_s13 }
  0x38   : > { %p857_p3 = pnand %p856_p13, %p855_p12 }
  0x39   : > { %p862_p6 = por %p861_p2, %p860_p1 }
  0x3a   : > { %p858_p0 = pneg %p857_p3 }
  0x3c   : > { %p863_p11 = pnand %p862_p6, %p858_p0 }
  0x3e   : > { %866 = shalt.err (!%p863_p11)
}
  0x3f   : > { %s867_s28 = scalar_lea.vmem %s1090_s10, 256  ;;  %s956_s6 = smov [#allocation2]  }
  0x40   : > { %p868_p7 = scmp.ne.s32.totalorder %s1090_s10, %s867_s28  ;;  %s872_s7 = sshll.u32 %s956_s6, 4  ;;  %s873_s7 = int_to_ptr.vmem [resolvable:$false] %s872_s7 }
  0x41   : > { %s874_s9 = scalar_lea.vmem %s873_s7, 512  ;;  %p875_p3 = scmp.lt.s32.totalorder %s1090_s10, %s873_s7 }
  0x42   : > { %p870_p9 = pnand %p868_p7, %p856_p13  ;;  %p876_p5 = scmp.lt.s32.totalorder %s874_s9, %s867_s28 }
  0x44   : > { %p871_p12 = pneg %p870_p9  ;;  %p877_p4 = por %p876_p5, %p875_p3 }
  0x46   : > { %p878_p8 = pnand %p877_p4, %p871_p12 }
  0x48   : > { %881 = shalt.err (!%p878_p8)
}
  0x49   : > { %s957_s13 = smov 128   ;;  %s958_s14 = smov 8  }
  0x4a   : > { %733 = dma.hbm_to_vmem [thread:$0]  (!%p1092_p10), %s1088_s8, 256, %s1090_s10, %s1096_s12, %s957_s13, %s957_s13, %s958_s14  }
  0x4b   : > { %p1211_p13 = scmp.ne.s32.totalorder %s1206_s26, 0 }
  0x4c   : > { %s1120_s16 = sand.u32 (!%p1211_p13), 1, %s942_s19   ;;  %p1212_p4 = scmp.ne.s32.totalorder (!%p1211_p13), %s1204_s24, 0 }
  0x4d   : > { %231 = sbr.rel (%p1211_p13) target bundleno = 538 (0x21a), region = 40  ;;  %s624_s17 = sshll.u32 (!%p1211_p13), %s1120_s16, 4 }
  0x4e   : > { %s234_s29 = scalar_lea.sflag (!%p1211_p13), [#allocation3], %s1120_s16  ;;  %s1126_s30 = scalar_lea.vmem (!%p1211_p13), [#allocation2], %s624_s17 }
  0x52   : > { %925 = dma.done.wait (%p1212_p4), %s234_s29, 256  }
  0x53   : > { %927 = vsyncadd (%p1212_p4), %s234_s29, 4294967040  ;;  %p1213_p8 = scmp.eq.s32.totalorder %s1015_s22, 0 }
  0x55   : > { %929 = dma.done.wait (%p1213_p8), [#allocation6], 2048   ;;  %p1214_p5 = pmov %p1213_p8 }
  0x56   : > { %v959_v0 = vmov 0.0   ;;  %vm960_vm0 = vmmov 0   ;;  %v786_v1 = vld [vmem:[#allocation5 + $0x38] sm:$0xff]   ;;  %v787_v2 = vld [vmem:[#allocation5 + $0x30] sm:$0xff]   ;;  %v788_v3 = vld [vmem:[#allocation5 + $0x28] sm:$0xff]   ;;  %s271_s11 = scalar_lea.vmem [#allocation8], %s624_s17 }
  0x57   : > { %931 = vsyncadd (%p1214_p5), [#allocation6], 4294965248  ;;  %671 = vmatprep.subr.bf16.mxu0 %v959_v0  ;;  %687 = vmatprep.mubr.msk.bf16.mxu0 %vm960_vm0, %v959_v0  ;;  %v794_v4 = vld [vmem:[#allocation7 + $0x38] sm:$0xff]   ;;  %v789_v5 = vld [vmem:[#allocation5 + $0x20] sm:$0xff]   ;;  %s523_s12 = sshll.u32 %s271_s11, 4  ;;  %s652_s28 = sshll.u32 %s1015_s22, 8  ;;  %s1147_s12 = int_to_ptr.vmem [resolvable:$true] %s523_s12 }
  0x58   : > { %691 = vmatprep.subr.bf16.mxu1 %v959_v0  ;;  %707 = vmatprep.mubr.msk.bf16.mxu1 %vm960_vm0, %v959_v0  ;;  %v795_v6 = vld [vmem:[#allocation7 + $0x30] sm:$0xff]   ;;  %v790_v7 = vld [vmem:[#allocation5 + $0x18] sm:$0xff]   ;;  %v796_v8 = vld [vmem:[#allocation7 + $0x28] sm:$0xff]   ;;  %s1152_s9 = scalar_lea.hbm %s1199_s5, %s652_s28  ;;  %s510_s13 = scalar_lea.sflag [#allocation4], %s1120_s16 }
  0x59   : > { %672 = vmatpush3.bf16.msra.mxu0 %v786_v1  ;;  %692 = vmatpush3.bf16.msra.mxu1 %v794_v4  ;;  %v791_v9 = vld [vmem:[#allocation5 + $0x10] sm:$0xff]   ;;  %v797_v10 = vld [vmem:[#allocation7 + $0x20] sm:$0xff]   ;;  %v792_v11 = vld [vmem:[#allocation5 + $0x8] sm:$0xff]   ;;  %s882_s14 = scalar_lea.vmem %s1147_s12, 256  ;;  %p1215_p0 = scmp.ne.s32.totalorder %s1209_s23, 0 }
  0x5a   : > { %673 = vmatprep.subr.bf16.mxu0 %v959_v0  ;;  %693 = vmatprep.subr.bf16.mxu1 %v959_v0  ;;  %v798_v12 = vld [vmem:[#allocation7 + $0x18] sm:$0xff]   ;;  %v793_v13 = vld [vmem:[#allocation5] sm:$0xff]   ;;  %v799_v17 = vld [vmem:[#allocation7 + $0x10] sm:$0xff]   ;;  %p883_p10 = scmp.ne.s32.totalorder %s1147_s12, %s882_s14  ;;  %s961_s22 = smov [#allocation8]  }
  0x5b   : > { %v275_v14 = vld [vmem:[%s1126_s30] sm:$0xff]  ;;  %v276_v15 = vld [vmem:[%s1126_s30 + $0x8] sm:$0xff]  ;;  %s886_s17 = sshll.u32 %s961_s22, 4  ;;  %s887_s17 = int_to_ptr.vmem [resolvable:$false] %s886_s17 }
  0x5c   : > { %v277_v16 = vpack.c.bf16 %v276_v15, %v275_v14  ;;  %v800_v18 = vld [vmem:[#allocation7 + $0x8] sm:$0xff]   ;;  %v801_v19 = vld [vmem:[#allocation7] sm:$0xff]   ;;  %p884_p1 = pnand %p883_p10, %p1215_p0  ;;  %s888_s29 = scalar_lea.vmem %s887_s17, 512 }
  0x5d   : > { %674 = vmatpush3.bf16.msra.mxu0 %v787_v2  ;;  %694 = vmatpush3.bf16.msra.mxu1 %v795_v6  ;;  %v628_v20 = vld [vmem:[%s1196_s2] ss:$0 sm:$0xff]  ;;  %p889_p6 = scmp.lt.s32.totalorder %s1147_s12, %s887_s17  ;;  %p890_p11 = scmp.lt.s32.totalorder %s888_s29, %s882_s14 }
  0x5e   : > { %675 = vmatprep.subr.bf16.mxu0 %v959_v0  ;;  %695 = vmatprep.subr.bf16.mxu1 %v959_v0  ;;  %v637_v30 = vld [vmem:[%s1198_s4] ss:$0 sm:$0xff]  ;;  %p885_p2 = pneg %p884_p1 }
  0x5f   : > { %p891_p7 = por %p890_p11, %p889_p6 }
  0x61   : > { %676 = vmatpush3.bf16.msra.mxu0 %v788_v3  ;;  %696 = vmatpush3.bf16.msra.mxu1 %v796_v8  ;;  %p892_p9 = pnand %p891_p7, %p885_p2 }
  0x62   : > { %677 = vmatprep.subr.bf16.mxu0 %v959_v0  ;;  %697 = vmatprep.subr.bf16.mxu1 %v959_v0 }
  0x65   : > { %678 = vmatpush3.bf16.msra.mxu0 %v789_v5  ;;  %698 = vmatpush3.bf16.msra.mxu1 %v797_v10 }
  0x66   : > { %679 = vmatprep.subr.bf16.mxu0 %v959_v0  ;;  %699 = vmatprep.subr.bf16.mxu1 %v959_v0 }
  0x69   : > { %680 = vmatpush3.bf16.msra.mxu0 %v790_v7  ;;  %700 = vmatpush3.bf16.msra.mxu1 %v798_v12 }
  0x6a   : > { %681 = vmatprep.subr.bf16.mxu0 %v959_v0  ;;  %701 = vmatprep.subr.bf16.mxu1 %v959_v0 }
  0x6d   : > { %682 = vmatpush3.bf16.msra.mxu0 %v791_v9  ;;  %702 = vmatpush3.bf16.msra.mxu1 %v799_v17 }
  0x6e   : > { %683 = vmatprep.subr.bf16.mxu0 %v959_v0  ;;  %703 = vmatprep.subr.bf16.mxu1 %v959_v0 }
  0x71   : > { %684 = vmatpush3.bf16.msra.mxu0 %v792_v11  ;;  %704 = vmatpush3.bf16.msra.mxu1 %v800_v18 }
  0x72   : > { %685 = vmatprep.subr.bf16.mxu0 %v959_v0  ;;  %705 = vmatprep.subr.bf16.mxu1 %v959_v0 }
  0x75   : > { %686 = vmatpush3.bf16.msra.mxu0 %v793_v13  ;;  %706 = vmatpush3.bf16.msra.mxu1 %v801_v19 }
  0x78   : > { %688 = vmatmul.mubr.bf16.vlgmr.msra.gmra.mxu0 %v277_v16 }
 0x138   : > { %v383_v21 = vpop.f32.mrf.mxu0 }
 0x139   : > { %v384_v23 = vadd.f32 %v628_v20, %v383_v21 }
 0x13a   : > { %v689_v22 = vpop.f32.mrf.mxu0 }
 0x13b   : > { %v390_v27 = vmax.f32 %v384_v23, 0.0 }
 0x13c   : > { %v386_v24 = vpop.f32.mrf.mxu0 }
 0x13d   : > { %v387_v25 = vadd.f32 %v628_v20, %v386_v24 }
 0x13e   : > { %v690_v26 = vpop.f32.mrf.mxu0 }
 0x13f   : > { %v391_v28 = vmax.f32 %v387_v25, 0.0 }
 0x141   : > { %v392_v29 = vpack.c.bf16 %v391_v28, %v390_v27 }
 0x143   : > { %708 = vmatmul.mubr.bf16.vlgmr.msra.gmra.mxu1 %v392_v29 }
 0x203   : > { %v498_v31 = vpop.f32.mrf.mxu1 }
 0x204   : > { %v499_v32 = vadd.f32 %v637_v30, %v498_v31 }
 0x205   : > { %v709_v33 = vpop.f32.mrf.mxu1 }
 0x206   : > { %v505_v34 = vadd.f32 %v499_v32, %v275_v14 }
 0x207   : > { %v501_v35 = vpop.f32.mrf.mxu1 }
 0x208   : > { %507 = vst [vmem:[%s271_s11] sm:$0xff] %v505_v34  ;;  %v502_v36 = vadd.f32 %v637_v30, %v501_v35 }
 0x209   : > { %v710_v37 = vpop.f32.mrf.mxu1 }
 0x20a   : > { %v506_v38 = vadd.f32 %v502_v36, %v276_v15 }
 0x20c   : > { %508 = vst [vmem:[%s271_s11 + $0x8] sm:$0xff] %v506_v38 }
 0x20d   : > { %895 = shalt.err (!%p892_p9)
}
 0x20e   : > { %s896_s30 = scalar_lea.hbm %s1152_s9, 256  ;;  %s900_s8 = scalar_lea.hbm %s1199_s5, 2048 }
 0x20f   : > { %p897_p12 = scmp.ne.s32.totalorder %s1152_s9, %s896_s30  ;;  %p901_p4 = scmp.lt.s32.totalorder %s1152_s9, %s1199_s5 }
 0x210   : > { %p902_p8 = scmp.lt.s32.totalorder %s900_s8, %s896_s30 }
 0x211   : > { %p898_p3 = pnand %p897_p12, %p1215_p0 }
 0x212   : > { %p903_p5 = por %p902_p8, %p901_p4 }
 0x213   : > { %p899_p13 = pneg %p898_p3 }
 0x215   : > { %p904_p10 = pnand %p903_p5, %p899_p13 }
 0x217   : > { %907 = shalt.err (!%p904_p10)
}
 0x218   : > { %s962_s28 = smov 128   ;;  %s963_s6 = smov 8  }
 0x219   : > { %721 = dma.vmem_to_hbm [thread:$0]  (%p1215_p0), %s1147_s12, 256, %s1152_s9, %s510_s13, %s962_s28, %s962_s28, %s963_s6  }
 0x21a PF: > { %p743_p1 = scmp.ge.s32.totalorder %s950_s21, 2  ;;  %s538_s7 = sand.u32 1, %s938_s18  }
 0x21b   : > { %p1216_p2 = scmp.ne.s32.totalorder %s1205_s25, 0  ;;  %s539_s14 = scalar_lea.sflag [#allocation4], %s538_s7 }
 0x21d   : > { %p735_p6 = pnand %p743_p1, %p1216_p2 }
 0x21f   : > { %p736_p11 = pneg %p735_p6 }
 0x221   : > { %933 = dma.done.wait (%p736_p11), %s539_s14, 256  }
 0x222   : > { %935 = vsyncadd (%p736_p11), %s539_s14, 4294967040  ;;  %p19_p7 = scmp.ge.s32.totalorder %s1065_s15, 10   ;;  %s1217_s18 = smov %s942_s19 }
 0x223   : > { %s1218_s19 = smov %s946_s20  ;;  %s1219_s20 = smov %s1081_s27 }
 0x224   : > { %s1220_s21 = smov %s1065_s15  ;;  %21 = sbr.rel (!%p19_p7) target bundleno = 6 (0x6), region = 93 }
 0x229   :  { %544 = vsyncpa [#allocation3], 1 }
 0x22a   :  { %546 = vsyncpa [#allocation3 + $0x1], 1 }
 0x22b   :  { %547 = vsyncpa [#allocation6], 1 }
 0x22c   :  { %548 = vsyncpa [#allocation4], 1 }
 0x22d   :  { %550 = vsyncpa [#allocation4 + $0x1], 1 }

</bundles_post_ra>
